<compile_context>
chip_gen: v7x
topology: tpu7x:2x2x1
jax: 0.10.0
libtpu: 0.0.40
codegen_flags: <defaults>
</compile_context>

<pallas_src>
import re

import jax
import jax.numpy as jnp
from jax.experimental import pallas as pl
from jax.experimental.pallas import tpu as pltpu


_LN_EPS = 1e-3     # LayerNorm eps


def _round_up(x, m):
    return (x + m - 1) // m * m


def _choose_tm(m):
    """Pick the row-tile size: least padding waste (candidates 512/256/128/64,
    or the exact 8-multiple for tiny batches), then prefer >= 2 grid steps so
    the parallel axis can feed both v7x TensorCores."""
    m8 = _round_up(max(m, 8), 8)
    if m8 <= 64:
        tm = m8
    else:
        best = None
        tm = 64
        for c in (512, 256, 128, 64):
            waste = _round_up(m8, c) - m8
            key = (waste, -c)                 # least waste, then largest tile
            if best is None or key < best:
                best, tm = key, c
    m_pad = _round_up(m8, tm)
    if m_pad // tm == 1 and tm >= 16 and (tm // 2) % 8 == 0:
        tm //= 2                              # >=2 steps at no extra padding
        m_pad = _round_up(m8, tm)
    return tm, m_pad


def _make_fused_kernel(n_layers, real_widths):
    """One fused kernel: n_layers x (Linear -> LayerNorm -> ELU) + one
    lane-dense concatenated head matmul.  Layer count is static, so the loop
    is a plain Python for (fully unrolled for the LLO scheduler)."""
    inv_d = [1.0 / float(w) for w in real_widths]

    def kernel(x_ref, *refs):
        out_ref = refs[-1]
        x = x_ref[...]                                    # f32 (tm, feat_pad)
        idx = 0
        for li in range(n_layers):
            w = refs[idx][...]                            # bf16 (din, dout)
            bgb = refs[idx + 1][...]                      # f32 (3, dout)
            idx += 2
            # bf16 MXU matmul, f32 accumulation; bias add in f32.
            y = jnp.dot(x.astype(jnp.bfloat16), w,
                        preferred_element_type=jnp.float32)
            y = y + bgb[0:1, :]
            # One-pass LayerNorm stats over the REAL width (padded lanes are
            # exactly zero, so full-width sums equal real-width sums).
            s1 = jnp.sum(y, axis=-1, keepdims=True)
            s2 = jnp.sum(y * y, axis=-1, keepdims=True)
            mean = s1 * inv_d[li]
            var = s2 * inv_d[li] - mean * mean
            inv_std = jax.lax.rsqrt(var + _LN_EPS)
            y = (y - mean) * (inv_std * bgb[1:2, :]) + bgb[2:3, :]
            # ELU (alpha=1): single EUP transcendental on the negative branch.
            x = jnp.where(y > 0.0, y, jnp.exp(y) - 1.0)   # f32 epilogue
        hw = refs[idx][...]                               # bf16 (d, o_pad)
        hb = refs[idx + 1][...]                           # f32 (1, o_pad)
        out_ref[...] = jnp.dot(x.astype(jnp.bfloat16), hw,
                               preferred_element_type=jnp.float32) + hb

    return kernel


class BaseDecoderPallas:
    """MLP branch of BaseDecoder as a single fused Pallas TPU kernel."""

    def __init__(self, shapes, cnn_keys='.*', mlp_keys='.*',
                 mlp_layers=(400, 400, 400, 400), mlp_input_dim=None,
                 key=None):
        self._shapes = dict(shapes)
        self.cnn_keys = [k for k, v in shapes.items()
                         if re.match(cnn_keys, k) and len(v) == 3]
        self.mlp_keys = [k for k, v in shapes.items()
                         if re.match(mlp_keys, k) and len(v) == 1]
        print('Decoder CNN outputs:', list(self.cnn_keys))
        print('Decoder MLP outputs:', list(self.mlp_keys))
        assert not self.cnn_keys, "_cnn is abstract; only MLP outputs supported"
        assert mlp_input_dim is not None

        self._mlp_layers = list(mlp_layers)
        self._mlp_input_dim = int(mlp_input_dim)
        if key is None:
            key = jax.random.PRNGKey(0)

        # ---------------- reference (unpadded, f32) parameters --------------
        self.params = {}
        d = self._mlp_input_dim
        for i, width in enumerate(self._mlp_layers):
            key, kw, kb = jax.random.split(key, 3)
            scale = 1.0 / float(d) ** 0.5
            self.params[f'dense{i}_w'] = jax.random.uniform(
                kw, (d, width), jnp.float32, -scale, scale)
            self.params[f'dense{i}_b'] = jax.random.uniform(
                kb, (1, width), jnp.float32, -scale, scale)
            self.params[f'norm{i}_g'] = jnp.ones((1, width), jnp.float32)
            self.params[f'norm{i}_b'] = jnp.zeros((1, width), jnp.float32)
            d = width

        self._head_dims = [int(self._shapes[k][0]) for k in self.mlp_keys]
        for k, out_dim in zip(self.mlp_keys, self._head_dims):
            key, kw, kb = jax.random.split(key, 3)
            scale = 1.0 / float(d) ** 0.5
            self.params[f'head_{k}_w'] = jax.random.uniform(
                kw, (d, out_dim), jnp.float32, -scale, scale)
            self.params[f'head_{k}_b'] = jax.random.uniform(
                kb, (1, out_dim), jnp.float32, -scale, scale)

        if not self.mlp_keys:
            return

        # ---------------- kernel (padded / packed) parameters ---------------
        # bf16 weights padded to 128-lane multiples; packed f32 (3, width)
        # bias/gamma/beta.  Zero pad columns + zero gamma/beta keep pad lanes
        # exactly zero through Linear/LN/ELU, so the lane-dense computation is
        # equivalent to the unpadded one.
        self._feat_pad = _round_up(self._mlp_input_dim, 128)
        self._widths_pad = [_round_up(w, 128) for w in self._mlp_layers]
        self.kparams = {}
        d_real, d_pad = self._mlp_input_dim, self._feat_pad
        for i, (w_real, w_pad) in enumerate(zip(self._mlp_layers,
                                                self._widths_pad)):
            wp = jnp.zeros((d_pad, w_pad), jnp.float32)
            wp = wp.at[:d_real, :w_real].set(self.params[f'dense{i}_w'])
            self.kparams[f'dense{i}_w'] = wp.astype(jnp.bfloat16)
            bgb = jnp.zeros((3, w_pad), jnp.float32)
            bgb = bgb.at[0, :w_real].set(self.params[f'dense{i}_b'][0])
            bgb = bgb.at[1, :w_real].set(self.params[f'norm{i}_g'][0])
            bgb = bgb.at[2, :w_real].set(self.params[f'norm{i}_b'][0])
            self.kparams[f'ln{i}_bgb'] = bgb
            d_real, d_pad = w_real, w_pad

        # Concatenated + lane-padded head (one lane-dense matmul, unmasked vst).
        self._o_total = sum(self._head_dims)
        self._o_pad = max(128, _round_up(self._o_total, 128))
        hw = jnp.concatenate(
            [self.params[f'head_{k}_w'] for k in self.mlp_keys], axis=1)
        hb = jnp.concatenate(
            [self.params[f'head_{k}_b'] for k in self.mlp_keys], axis=1)
        hwp = jnp.zeros((d_pad, self._o_pad), jnp.float32)
        hwp = hwp.at[:d_real, :self._o_total].set(hw)
        self.kparams['head_cat_w'] = hwp.astype(jnp.bfloat16)
        hbp = jnp.zeros((1, self._o_pad), jnp.float32)
        hbp = hbp.at[0, :self._o_total].set(hb[0])
        self.kparams['head_cat_b'] = hbp

        # One jit for the whole forward pass (no per-layer dispatch).
        self._forward = jax.jit(self._build_forward())

    # ----------------------------------------------------------------------
    def _build_forward(self):
        n_layers = len(self._mlp_layers)
        feat = self._mlp_input_dim
        feat_pad = self._feat_pad
        widths_pad = list(self._widths_pad)
        o_pad = self._o_pad
        head_dims = list(self._head_dims)
        mlp_keys = list(self.mlp_keys)
        kernel = _make_fused_kernel(n_layers, list(self._mlp_layers))

        def forward(kparams, features):
            lead = features.shape[:-1]
            x = features.reshape((-1, feat)).astype(jnp.float32)
            m = x.shape[0]

            tm, m_pad = _choose_tm(m)
            if (m_pad != m) or (feat_pad != feat):
                x = jnp.pad(x, ((0, m_pad - m), (0, feat_pad - feat)))

            ops = [x]
            in_specs = [pl.BlockSpec((tm, feat_pad), lambda i: (i, 0))]
            for li in range(n_layers):
                for name in (f'dense{li}_w', f'ln{li}_bgb'):
                    p = kparams[name]
                    ops.append(p)
                    # Constant block index -> weights stay resident in VMEM
                    # across grid steps (no per-tile re-DMA).
                    in_specs.append(pl.BlockSpec(p.shape, lambda i: (0, 0)))
            for name in ('head_cat_w', 'head_cat_b'):
                p = kparams[name]
                ops.append(p)
                in_specs.append(pl.BlockSpec(p.shape, lambda i: (0, 0)))

            param_bytes = sum(int(o.size) * int(o.dtype.itemsize)
                              for o in ops[1:])
            io_tile_bytes = tm * (feat_pad + o_pad) * 4
            vmem_bytes = int(min(max(2 * param_bytes + 4 * io_tile_bytes
                                     + (4 << 20), 32 << 20), 96 << 20))

            dims = [feat_pad] + widths_pad + [o_pad]
            flops = 2 * m_pad * sum(a * b for a, b in zip(dims[:-1], dims[1:]))
            transc = m_pad * (sum(widths_pad) + 2 * n_layers)
            bytes_acc = m_pad * (feat_pad + o_pad) * 4 + param_bytes
            cost = pl.CostEstimate(flops=int(flops),
                                   transcendentals=int(transc),
                                   bytes_accessed=int(bytes_acc))

            out = pl.pallas_call(
                kernel,
                out_shape=jax.ShapeDtypeStruct((m_pad, o_pad), jnp.float32),
                grid=(m_pad // tm,),
                in_specs=in_specs,
                out_specs=pl.BlockSpec((tm, o_pad), lambda i: (i, 0)),
                compiler_params=pltpu.CompilerParams(
                    dimension_semantics=("parallel",),
                    vmem_limit_bytes=vmem_bytes),
                cost_estimate=cost,
            )(*ops)

            out = out[:m]
            outputs = {}
            off = 0
            for k, dk in zip(mlp_keys, head_dims):
                outputs[k] = out[:, off:off + dk].reshape(lead + (dk,))
                off += dk
            return outputs

        return forward

    def __call__(self, features):
        if not self.mlp_keys:
            return {}
        return self._forward(self.kparams, features)


# ----------------------------------------------------------------------------
# Pure-JAX reference for the parity check (mirrors the kernel's dtype plan:
# bf16 matmul inputs, f32 accumulation, f32 LayerNorm/ELU epilogue).
# ----------------------------------------------------------------------------
def reference_forward(dec, features):
    lead = features.shape[:-1]
    x = features.reshape((-1, dec._mlp_input_dim)).astype(jnp.float32)
    for i, _ in enumerate(dec._mlp_layers):
        w = dec.params[f'dense{i}_w'].astype(jnp.bfloat16)
        y = jnp.dot(x.astype(jnp.bfloat16), w,
                    preferred_element_type=jnp.float32)
        y = y + dec.params[f'dense{i}_b']
        m = jnp.mean(y, axis=-1, keepdims=True)
        v = jnp.mean(y * y, axis=-1, keepdims=True) - m * m
        y = (y - m) * jax.lax.rsqrt(v + _LN_EPS)
        y = y * dec.params[f'norm{i}_g'] + dec.params[f'norm{i}_b']
        x = jnp.where(y > 0, y, jnp.exp(y) - 1.0)
    out = {}
    for k in dec.mlp_keys:
        w = dec.params[f'head_{k}_w'].astype(jnp.bfloat16)
        o = (jnp.dot(x.astype(jnp.bfloat16), w,
                     preferred_element_type=jnp.float32)
             + dec.params[f'head_{k}_b'])
        out[k] = o.reshape(lead + (dec._shapes[k][0],))
    return out


if __name__ == "__main__":
    key = jax.random.PRNGKey(0)
    key, kf, kp = jax.random.split(key, 3)

    # Small shapes: batch=2, time=8 (flattened to 16 rows), 32-d features,
    # two trunk layers of width 128, two vector heads (reward, state).
    B, T, FEAT = 2, 8, 32
    shapes = {'reward': (1,), 'state': (16,)}
    mlp_layers = [128, 128]

    decoder = BaseDecoderPallas(shapes, mlp_layers=mlp_layers,
                                mlp_input_dim=FEAT, key=kp)

    features = jax.random.normal(kf, (B, T, FEAT), jnp.float32)

    outputs = decoder(features)
    jax.block_until_ready(outputs)

    ref = reference_forward(decoder, features)
    for k in outputs:
        assert outputs[k].shape == (B, T) + shapes[k], (
            k, outputs[k].shape, (B, T) + shapes[k])
        err = float(jnp.max(jnp.abs(outputs[k] - ref[k])))
        assert err < 2e-3, f"mismatch on {k}: {err}"

    print("KERNEL_OK")
</pallas_src>

<mosaic_0001>
module attributes {stable_mosaic.version = 11 : i64} {
  func.func @kernel(%arg0: i32, %arg1: memref<8x128xf32, #tpu.memory_space<vmem>>, %arg2: memref<128x128xbf16, #tpu.memory_space<vmem>>, %arg3: memref<3x128xf32, #tpu.memory_space<vmem>>, %arg4: memref<128x128xbf16, #tpu.memory_space<vmem>>, %arg5: memref<3x128xf32, #tpu.memory_space<vmem>>, %arg6: memref<128x128xbf16, #tpu.memory_space<vmem>>, %arg7: memref<1x128xf32, #tpu.memory_space<vmem>>, %arg8: memref<8x128xf32, #tpu.memory_space<vmem>>) attributes {dimension_semantics = [#tpu.dimension_semantics<parallel>], iteration_bounds = array<i64: 2>, scalar_prefetch = 0 : i64, scratch_operands = 0 : i64, tpu.core_type = #tpu.core_type<tc>, window_params = [{transform_indices = @transform_0, window_bounds = array<i64: 8, 128>}, {pipeline_mode = #tpu.pipeline_mode<synchronous>, transform_indices = @transform_1, window_bounds = array<i64: 128, 128>}, {pipeline_mode = #tpu.pipeline_mode<synchronous>, transform_indices = @transform_2, window_bounds = array<i64: 3, 128>}, {pipeline_mode = #tpu.pipeline_mode<synchronous>, transform_indices = @transform_3, window_bounds = array<i64: 128, 128>}, {pipeline_mode = #tpu.pipeline_mode<synchronous>, transform_indices = @transform_4, window_bounds = array<i64: 3, 128>}, {pipeline_mode = #tpu.pipeline_mode<synchronous>, transform_indices = @transform_5, window_bounds = array<i64: 128, 128>}, {pipeline_mode = #tpu.pipeline_mode<synchronous>, transform_indices = @transform_6, window_bounds = array<i64: 1, 128>}, {transform_indices = @transform_7, window_bounds = array<i64: 8, 128>}]} {
    %c0 = arith.constant 0 : index
    %c0_0 = arith.constant 0 : index
    %0 = vector.load %arg1[%c0, %c0_0] : memref<8x128xf32, #tpu.memory_space<vmem>>, vector<8x128xf32>
    %c0_1 = arith.constant 0 : index
    %c0_2 = arith.constant 0 : index
    %1 = vector.load %arg2[%c0_1, %c0_2] : memref<128x128xbf16, #tpu.memory_space<vmem>>, vector<128x128xbf16>
    %c0_3 = arith.constant 0 : index
    %c0_4 = arith.constant 0 : index
    %2 = vector.load %arg3[%c0_3, %c0_4] : memref<3x128xf32, #tpu.memory_space<vmem>>, vector<3x128xf32>
    %3 = arith.truncf %0 : vector<8x128xf32> to vector<8x128xbf16>
    %cst = arith.constant dense<0.000000e+00> : vector<8x128xf32>
    %4 = tpu.matmul %3, %1, %cst {dimension_numbers = #tpu.dot_dimension_numbers<[1], [0], [0], [1], [0, 0, 1, 1], [], []>} : vector<8x128xbf16>, vector<128x128xbf16>, vector<8x128xf32> -> vector<8x128xf32>
    %5 = vector.extract_strided_slice %2 {offsets = [0, 0], sizes = [1, 128], strides = [1, 1]} : vector<3x128xf32> to vector<1x128xf32>
    %6 = vector.broadcast %5 : vector<1x128xf32> to vector<8x128xf32>
    %7 = arith.addf %4, %6 : vector<8x128xf32>
    %cst_5 = arith.constant dense<0.000000e+00> : vector<8xf32>
    %8 = vector.multi_reduction <add>, %7, %cst_5 [1] : vector<8x128xf32> to vector<8xf32>
    %9 = vector.shape_cast %8 : vector<8xf32> to vector<8x1xf32>
    %10 = arith.mulf %7, %7 : vector<8x128xf32>
    %cst_6 = arith.constant dense<0.000000e+00> : vector<8xf32>
    %11 = vector.multi_reduction <add>, %10, %cst_6 [1] : vector<8x128xf32> to vector<8xf32>
    %12 = vector.shape_cast %11 : vector<8xf32> to vector<8x1xf32>
    %cst_7 = arith.constant 7.812500e-03 : f32
    %13 = vector.broadcast %cst_7 : f32 to vector<8x1xf32>
    %14 = arith.mulf %9, %13 : vector<8x1xf32>
    %cst_8 = arith.constant 7.812500e-03 : f32
    %15 = vector.broadcast %cst_8 : f32 to vector<8x1xf32>
    %16 = arith.mulf %12, %15 : vector<8x1xf32>
    %17 = arith.mulf %14, %14 : vector<8x1xf32>
    %18 = arith.subf %16, %17 : vector<8x1xf32>
    %cst_9 = arith.constant 1.000000e-03 : f32
    %19 = vector.broadcast %cst_9 : f32 to vector<8x1xf32>
    %20 = arith.addf %18, %19 : vector<8x1xf32>
    %21 = math.rsqrt %20 : vector<8x1xf32>
    %22 = vector.broadcast %14 : vector<8x1xf32> to vector<8x128xf32>
    %23 = arith.subf %7, %22 : vector<8x128xf32>
    %24 = vector.extract_strided_slice %2 {offsets = [1, 0], sizes = [1, 128], strides = [1, 1]} : vector<3x128xf32> to vector<1x128xf32>
    %25 = vector.broadcast %21 : vector<8x1xf32> to vector<8x128xf32>
    %26 = vector.broadcast %24 : vector<1x128xf32> to vector<8x128xf32>
    %27 = arith.mulf %25, %26 : vector<8x128xf32>
    %28 = arith.mulf %23, %27 : vector<8x128xf32>
    %29 = vector.extract_strided_slice %2 {offsets = [2, 0], sizes = [1, 128], strides = [1, 1]} : vector<3x128xf32> to vector<1x128xf32>
    %30 = vector.broadcast %29 : vector<1x128xf32> to vector<8x128xf32>
    %31 = arith.addf %28, %30 : vector<8x128xf32>
    %cst_10 = arith.constant 0.000000e+00 : f32
    %32 = vector.broadcast %cst_10 : f32 to vector<8x128xf32>
    %33 = arith.cmpf ogt, %31, %32 : vector<8x128xf32>
    %34 = math.exp %31 : vector<8x128xf32>
    %cst_11 = arith.constant 1.000000e+00 : f32
    %35 = vector.broadcast %cst_11 : f32 to vector<8x128xf32>
    %36 = arith.subf %34, %35 : vector<8x128xf32>
    %37 = arith.select %33, %31, %36 : vector<8x128xi1>, vector<8x128xf32>
    %c0_12 = arith.constant 0 : index
    %c0_13 = arith.constant 0 : index
    %38 = vector.load %arg4[%c0_12, %c0_13] : memref<128x128xbf16, #tpu.memory_space<vmem>>, vector<128x128xbf16>
    %c0_14 = arith.constant 0 : index
    %c0_15 = arith.constant 0 : index
    %39 = vector.load %arg5[%c0_14, %c0_15] : memref<3x128xf32, #tpu.memory_space<vmem>>, vector<3x128xf32>
    %40 = arith.truncf %37 : vector<8x128xf32> to vector<8x128xbf16>
    %cst_16 = arith.constant dense<0.000000e+00> : vector<8x128xf32>
    %41 = tpu.matmul %40, %38, %cst_16 {dimension_numbers = #tpu.dot_dimension_numbers<[1], [0], [0], [1], [0, 0, 1, 1], [], []>} : vector<8x128xbf16>, vector<128x128xbf16>, vector<8x128xf32> -> vector<8x128xf32>
    %42 = vector.extract_strided_slice %39 {offsets = [0, 0], sizes = [1, 128], strides = [1, 1]} : vector<3x128xf32> to vector<1x128xf32>
    %43 = vector.broadcast %42 : vector<1x128xf32> to vector<8x128xf32>
    %44 = arith.addf %41, %43 : vector<8x128xf32>
    %cst_17 = arith.constant dense<0.000000e+00> : vector<8xf32>
    %45 = vector.multi_reduction <add>, %44, %cst_17 [1] : vector<8x128xf32> to vector<8xf32>
    %46 = vector.shape_cast %45 : vector<8xf32> to vector<8x1xf32>
    %47 = arith.mulf %44, %44 : vector<8x128xf32>
    %cst_18 = arith.constant dense<0.000000e+00> : vector<8xf32>
    %48 = vector.multi_reduction <add>, %47, %cst_18 [1] : vector<8x128xf32> to vector<8xf32>
    %49 = vector.shape_cast %48 : vector<8xf32> to vector<8x1xf32>
    %cst_19 = arith.constant 7.812500e-03 : f32
    %50 = vector.broadcast %cst_19 : f32 to vector<8x1xf32>
    %51 = arith.mulf %46, %50 : vector<8x1xf32>
    %cst_20 = arith.constant 7.812500e-03 : f32
    %52 = vector.broadcast %cst_20 : f32 to vector<8x1xf32>
    %53 = arith.mulf %49, %52 : vector<8x1xf32>
    %54 = arith.mulf %51, %51 : vector<8x1xf32>
    %55 = arith.subf %53, %54 : vector<8x1xf32>
    %cst_21 = arith.constant 1.000000e-03 : f32
    %56 = vector.broadcast %cst_21 : f32 to vector<8x1xf32>
    %57 = arith.addf %55, %56 : vector<8x1xf32>
    %58 = math.rsqrt %57 : vector<8x1xf32>
    %59 = vector.broadcast %51 : vector<8x1xf32> to vector<8x128xf32>
    %60 = arith.subf %44, %59 : vector<8x128xf32>
    %61 = vector.extract_strided_slice %39 {offsets = [1, 0], sizes = [1, 128], strides = [1, 1]} : vector<3x128xf32> to vector<1x128xf32>
    %62 = vector.broadcast %58 : vector<8x1xf32> to vector<8x128xf32>
    %63 = vector.broadcast %61 : vector<1x128xf32> to vector<8x128xf32>
    %64 = arith.mulf %62, %63 : vector<8x128xf32>
    %65 = arith.mulf %60, %64 : vector<8x128xf32>
    %66 = vector.extract_strided_slice %39 {offsets = [2, 0], sizes = [1, 128], strides = [1, 1]} : vector<3x128xf32> to vector<1x128xf32>
    %67 = vector.broadcast %66 : vector<1x128xf32> to vector<8x128xf32>
    %68 = arith.addf %65, %67 : vector<8x128xf32>
    %cst_22 = arith.constant 0.000000e+00 : f32
    %69 = vector.broadcast %cst_22 : f32 to vector<8x128xf32>
    %70 = arith.cmpf ogt, %68, %69 : vector<8x128xf32>
    %71 = math.exp %68 : vector<8x128xf32>
    %cst_23 = arith.constant 1.000000e+00 : f32
    %72 = vector.broadcast %cst_23 : f32 to vector<8x128xf32>
    %73 = arith.subf %71, %72 : vector<8x128xf32>
    %74 = arith.select %70, %68, %73 : vector<8x128xi1>, vector<8x128xf32>
    %c0_24 = arith.constant 0 : index
    %c0_25 = arith.constant 0 : index
    %75 = vector.load %arg6[%c0_24, %c0_25] : memref<128x128xbf16, #tpu.memory_space<vmem>>, vector<128x128xbf16>
    %c0_26 = arith.constant 0 : index
    %c0_27 = arith.constant 0 : index
    %76 = vector.load %arg7[%c0_26, %c0_27] : memref<1x128xf32, #tpu.memory_space<vmem>>, vector<1x128xf32>
    %77 = arith.truncf %74 : vector<8x128xf32> to vector<8x128xbf16>
    %cst_28 = arith.constant dense<0.000000e+00> : vector<8x128xf32>
    %78 = tpu.matmul %77, %75, %cst_28 {dimension_numbers = #tpu.dot_dimension_numbers<[1], [0], [0], [1], [0, 0, 1, 1], [], []>} : vector<8x128xbf16>, vector<128x128xbf16>, vector<8x128xf32> -> vector<8x128xf32>
    %79 = vector.broadcast %76 : vector<1x128xf32> to vector<8x128xf32>
    %80 = arith.addf %78, %79 : vector<8x128xf32>
    %c0_29 = arith.constant 0 : index
    %c0_30 = arith.constant 0 : index
    %81 = vector.load %arg8[%c0_29, %c0_30] : memref<8x128xf32, #tpu.memory_space<vmem>>, vector<8x128xf32>
    tpu.vector_store %arg8[%c0_29, %c0_30], %80 {strides = array<i32>} : memref<8x128xf32, #tpu.memory_space<vmem>>, vector<8x128xf32>,
    return
  }
  func.func @transform_0(%arg0: i32) -> (i32, i32) {
    %c0_i32 = arith.constant 0 : i32
    %c0_i32_0 = arith.constant 0 : i32
    return %arg0, %c0_i32 : i32, i32
  }
  func.func @transform_1(%arg0: i32) -> (i32, i32) {
    %c0_i32 = arith.constant 0 : i32
    %c0_i32_0 = arith.constant 0 : i32
    %c0_i32_1 = arith.constant 0 : i32
    return %c0_i32, %c0_i32_0 : i32, i32
  }
  func.func @transform_2(%arg0: i32) -> (i32, i32) {
    %c0_i32 = arith.constant 0 : i32
    %c0_i32_0 = arith.constant 0 : i32
    %c0_i32_1 = arith.constant 0 : i32
    return %c0_i32, %c0_i32_0 : i32, i32
  }
  func.func @transform_3(%arg0: i32) -> (i32, i32) {
    %c0_i32 = arith.constant 0 : i32
    %c0_i32_0 = arith.constant 0 : i32
    %c0_i32_1 = arith.constant 0 : i32
    return %c0_i32, %c0_i32_0 : i32, i32
  }
  func.func @transform_4(%arg0: i32) -> (i32, i32) {
    %c0_i32 = arith.constant 0 : i32
    %c0_i32_0 = arith.constant 0 : i32
    %c0_i32_1 = arith.constant 0 : i32
    return %c0_i32, %c0_i32_0 : i32, i32
  }
  func.func @transform_5(%arg0: i32) -> (i32, i32) {
    %c0_i32 = arith.constant 0 : i32
    %c0_i32_0 = arith.constant 0 : i32
    %c0_i32_1 = arith.constant 0 : i32
    return %c0_i32, %c0_i32_0 : i32, i32
  }
  func.func @transform_6(%arg0: i32) -> (i32, i32) {
    %c0_i32 = arith.constant 0 : i32
    %c0_i32_0 = arith.constant 0 : i32
    %c0_i32_1 = arith.constant 0 : i32
    return %c0_i32, %c0_i32_0 : i32, i32
  }
  func.func @transform_7(%arg0: i32) -> (i32, i32) {
    %c0_i32 = arith.constant 0 : i32
    %c0_i32_0 = arith.constant 0 : i32
    return %arg0, %c0_i32 : i32, i32
  }
}

</mosaic_0001>

<bundles_post_ra>
// kernel: forward.1
= control target key start
LH: loop header
LB: loop body
LE: loop exit
PB: predicated region body
PF: predicated region fallthrough
CT: control target
= control target key end

     0   :  { %12 = vsyncpa [#allocation3], 0  ;;  %s1322_s0 = inlined_call_operand.vmem [shape: f32[16,128], index: 0, kind: input, shape index: {}]   ;;  %s1323_s1 = inlined_call_operand.hbm [shape: bf16[128,128], index: 1, kind: input, shape index: {}]   ;;  %s1324_s2 = inlined_call_operand.vmem [shape: f32[3,128], index: 2, kind: input, shape index: {}]   ;;  %s1325_s3 = inlined_call_operand.hbm [shape: bf16[128,128], index: 3, kind: input, shape index: {}]   ;;  %s1326_s4 = inlined_call_operand.vmem [shape: f32[3,128], index: 4, kind: input, shape index: {}]   ;;  %s1327_s5 = inlined_call_operand.hbm [shape: bf16[128,128], index: 5, kind: input, shape index: {}]   ;;  %s1328_s6 = inlined_call_operand.vmem [shape: f32[1,128], index: 6, kind: input, shape index: {}]   ;;  %s1329_s7 = inlined_call_operand.vmem [shape: f32[16,128], index: 7, kind: output, shape index: {}]  }
   0x1   :  { %13 = vsyncpa [#allocation5], 0  ;;  %s1144_s24 = smov 0  }
   0x2 LB: > { %s1150_s25 = sadd.s32 4294967295, %s1095_s24   ;;  %p795_p0 = scmp.ge.s32.totalorder %s1095_s24, 1  ;;  %s1095_s24 = sphi %s1144_s24, %s19_s24  }
   0x3   : > { %p202_p1 = scmp.lt.s32.totalorder %s1095_s24, 3  ;;  %p1330_p2 = scmp.eq.s32.totalorder %s1150_s25, 0 }
   0x4   : > { %s1097_s27 = smov [#allocation4]   ;;  %s1098_s29 = smov [#allocation2]  }
   0x5   : > { %p1155_p3 = pnand %p795_p0, %p202_p1  ;;  %s230_s28 = sshll.u32 %s1097_s27, 4  ;;  %s231_s28 = int_to_ptr.vmem [resolvable:$true] %s230_s28 }
   0x6   : > { %s214_s30 = sshll.u32 %s1098_s29, 4  ;;  %s1099_s9 = smov [#allocation6]   ;;  %s1167_s30 = int_to_ptr.vmem [resolvable:$true] %s214_s30 }
   0x7   : > { %s1332_s26 = scalar_select %p1155_p3, 1, 0 }
   0x8   : > { %p934_p4 = pneg %p1155_p3  ;;  %s246_s10 = sshll.u32 %s1099_s9, 4  ;;  %s1169_s10 = int_to_ptr.vmem [resolvable:$true] %s246_s10 }
   0x9   : > { %s997_s13 = scalar_lea.hbm %s1325_s3, 1024 }
   0xa   : > { %p1163_p5 = pnand %p1330_p2, %p934_p4  ;;  %p998_p6 = scmp.ne.s32.totalorder %s1325_s3, %s997_s13 }
   0xb   : > { %p1004_p10 = scmp.lt.u32.totalorder %s997_s13, %s1325_s3 }
   0xc   : > { %p1179_p7 = pneg %p1163_p5 }
   0xe   : > { %p1000_p8 = pnand %p1179_p7, %p998_p6 }
  0x10   : > { %p1001_p9 = pneg %p1000_p8 }
  0x12   : > { %p1006_p11 = pnand %p1004_p10, %p1001_p9 }
  0x14   : > { %1009 = shalt.err (!%p1006_p11)
}
  0x15   : > { %s1010_s19 = scalar_lea.vmem %s231_s28, 1024  ;;  %p1018_p1 = scmp.lt.s32.totalorder %s231_s28, %s231_s28 }
  0x16   : > { %p1011_p12 = scmp.ne.s32.totalorder %s231_s28, %s1010_s19  ;;  %p1019_p4 = scmp.lt.s32.totalorder %s1010_s19, %s1010_s19 }
  0x18   : > { %p1013_p13 = pnand %p1011_p12, %p1179_p7  ;;  %p1020_p2 = por %p1019_p4, %p1018_p1 }
  0x1a   : > { %p1014_p0 = pneg %p1013_p13 }
  0x1c   : > { %p1021_p3 = pnand %p1020_p2, %p1014_p0 }
  0x1e   : > { %1024 = shalt.err (!%p1021_p3)
}
  0x1f   : > { %s1100_s20 = smov 64   ;;  %s1101_s21 = smov 4  }
  0x20   : > { %940 = dma.hbm_to_vmem [thread:$0]  (!%p1163_p5), %s1325_s3, 1024, %s231_s28, [#allocation5], %s1100_s20, %s1100_s20, %s1101_s21  }
  0x21   : > { %s1025_s9 = scalar_lea.hbm %s1323_s1, 1024 }
  0x22   : > { %p1026_p2 = scmp.ne.s32.totalorder %s1323_s1, %s1025_s9  ;;  %p1032_p8 = scmp.lt.u32.totalorder %s1025_s9, %s1323_s1 }
  0x24   : > { %p1028_p3 = pnand %p1026_p2, %p1179_p7 }
  0x26   : > { %p1029_p6 = pneg %p1028_p3 }
  0x28   : > { %p1034_p9 = pnand %p1032_p8, %p1029_p6 }
  0x2a   : > { %1037 = shalt.err (!%p1034_p9)
}
  0x2b   : > { %s1038_s28 = scalar_lea.vmem %s1167_s30, 1024  ;;  %p1046_p13 = scmp.lt.s32.totalorder %s1167_s30, %s1167_s30 }
  0x2c   : > { %p1039_p10 = scmp.ne.s32.totalorder %s1167_s30, %s1038_s28  ;;  %p1047_p0 = scmp.lt.s32.totalorder %s1038_s28, %s1038_s28 }
  0x2e   : > { %p1041_p11 = pnand %p1039_p10, %p1179_p7  ;;  %p1048_p1 = por %p1047_p0, %p1046_p13 }
  0x30   : > { %p1042_p12 = pneg %p1041_p11 }
  0x32   : > { %p1049_p4 = pnand %p1048_p1, %p1042_p12 }
  0x34   : > { %1052 = shalt.err (!%p1049_p4)
}
  0x35   : > { %937 = dma.hbm_to_vmem [thread:$0]  (!%p1163_p5), %s1323_s1, 1024, %s1167_s30, [#allocation3], %s1100_s20, %s1100_s20, %s1101_s21  }
  0x36   : > { %s1053_s22 = scalar_lea.hbm %s1327_s5, 1024 }
  0x37   : > { %p1054_p2 = scmp.ne.s32.totalorder %s1327_s5, %s1053_s22  ;;  %p1060_p8 = scmp.lt.u32.totalorder %s1053_s22, %s1327_s5 }
  0x39   : > { %p1056_p3 = pnand %p1054_p2, %p1179_p7 }
  0x3b   : > { %p1057_p6 = pneg %p1056_p3 }
  0x3d   : > { %p1062_p9 = pnand %p1060_p8, %p1057_p6 }
  0x3f   : > { %1065 = shalt.err (!%p1062_p9)
}
  0x40   : > { %s1066_s30 = scalar_lea.vmem %s1169_s10, 1024  ;;  %p1074_p13 = scmp.lt.s32.totalorder %s1169_s10, %s1169_s10 }
  0x41   : > { %p1067_p10 = scmp.ne.s32.totalorder %s1169_s10, %s1066_s30  ;;  %p1075_p0 = scmp.lt.s32.totalorder %s1066_s30, %s1066_s30 }
  0x43   : > { %p1069_p11 = pnand %p1067_p10, %p1179_p7  ;;  %p1076_p1 = por %p1075_p0, %p1074_p13 }
  0x45   : > { %p1070_p12 = pneg %p1069_p11 }
  0x47   : > { %p1077_p4 = pnand %p1076_p1, %p1070_p12 }
  0x49   : > { %1080 = shalt.err (!%p1077_p4)
}
  0x4a   : > { %943 = dma.hbm_to_vmem [thread:$0]  (!%p1163_p5), %s1327_s5, 1024, %s1169_s10, [#allocation5], %s1100_s20, %s1100_s20, %s1101_s21  }
  0x4b   : > { %p1335_p2 = scmp.ne.s32.totalorder %s1332_s26, 0 }
  0x4c   : > { %p1336_p7 = scmp.eq.s32.totalorder (!%p1335_p2), %s1150_s25, 0 }
  0x4d   : > { %272 = sbr.rel (%p1335_p2) target bundleno = 1140 (0x474), region = 48 }
  0x54   : > { %1086 = dma.done.wait (%p1336_p7), [#allocation3], 1024   ;;  %p1337_p3 = pmov %p1336_p7 }
  0x56   : > { %1088 = vsyncadd (%p1337_p3), [#allocation3], 4294966272  ;;  %p1338_p6 = pmov %p1337_p3 }
  0x57   : > { %p1339_p8 = pmov %p1337_p3 }
  0x58   : > { %1090 = dma.done.wait (%p1338_p6), [#allocation5], 2048  }
  0x59   : > { %1092 = vsyncadd (%p1339_p8), [#allocation5], 4294965248  ;;  %v1102_v0 = vmov 0.0   ;;  %vm1103_vm0 = vmmov 0   ;;  %v965_v1 = vld [vmem:[#allocation2] sm:$0xff]   ;;  %v966_v2 = vld [vmem:[#allocation2 + $0x8] sm:$0xff]   ;;  %v338_v11 = vlaneseq }
  0x5a   : > { %862 = vmatprep.subr.bf16.mxu0 %v1102_v0  ;;  %878 = vmatprep.mubr.msk.bf16.mxu0 %vm1103_vm0, %v1102_v0  ;;  %p310_p5 = scmp.lt.s32.totalorder %s1150_s25, 1  ;;  %v967_v3 = vld [vmem:[#allocation2 + $0x10] sm:$0xff]   ;;  %v968_v4 = vld [vmem:[#allocation2 + $0x18] sm:$0xff]   ;;  %v969_v5 = vld [vmem:[#allocation2 + $0x20] sm:$0xff]  }
  0x5b   : > { %882 = vmatprep.subr.bf16.mxu1 %v1102_v0  ;;  %898 = vmatprep.mubr.msk.bf16.mxu1 %vm1103_vm0, %v1102_v0  ;;  %v970_v6 = vld [vmem:[#allocation2 + $0x28] sm:$0xff]   ;;  %v971_v7 = vld [vmem:[#allocation2 + $0x30] sm:$0xff]   ;;  %v972_v8 = vld [vmem:[#allocation2 + $0x38] sm:$0xff]   ;;  %v1286_v12 = vshrl.u32 %v338_v11, 7 }
  0x5c   : > { %863 = vmatpush3.bf16.msra.mxu0 %v965_v1  ;;  %s1341_s25 = smov (!%p310_p5, %s1150_s25), 1  ;;  %v336_v14 = vld [vmem:[%s1324_s2] sm:$0x7]  ;;  %v974_v23 = vld [vmem:[#allocation4 + $0x8] sm:$0xff]   ;;  %v975_v24 = vld [vmem:[#allocation4 + $0x10] sm:$0xff]  }
  0x5d   : > { %864 = vmatprep.subr.bf16.mxu0 %v1102_v0  ;;  %s804_s26 = sshll.u32 %s1341_s25, 3  ;;  %v340_v13 = vsub.s32 0, %v1286_v12  ;;  %v973_v22 = vld [vmem:[#allocation4] sm:$0xff]   ;;  %v976_v25 = vld [vmem:[#allocation4 + $0x18] sm:$0xff]   ;;  %v978_v27 = vld [vmem:[#allocation4 + $0x28] sm:$0xff]   ;;  %v444_v37 = vsub.s32 1, %v1286_v12 }
  0x5e   : > { %s313_s16 = scalar_lea.vmem %s1322_s0, %s804_s26  ;;  %883 = vmatpush3.bf16.msra.mxu1 %v973_v22  ;;  %v977_v26 = vld [vmem:[#allocation4 + $0x20] sm:$0xff]   ;;  %v979_v28 = vld [vmem:[#allocation4 + $0x30] sm:$0xff]   ;;  %v980_v29 = vld [vmem:[#allocation4 + $0x38] sm:$0xff]   ;;  %v450_v39 = vsub.s32 2, %v1286_v12  ;;  %s317_s19 = scalar_lea.vmem %s1329_s7, %s804_s26 }
  0x5f   : > { %v319_v9 = vld [vmem:[%s313_s16] sm:$0xff]  ;;  %v341_v15 = vrot.slane %v336_v14, %v340_v13  ;;  %884 = vmatprep.subr.bf16.mxu1 %v1102_v0  ;;  %v445_v38 = vrot.slane %v336_v14, %v444_v37  ;;  %v982_v60 = vld [vmem:[#allocation6 + $0x8] sm:$0xff]   ;;  %v983_v61 = vld [vmem:[#allocation6 + $0x10] sm:$0xff]  }
  0x60   : > { %865 = vmatpush3.bf16.msra.mxu0 %v966_v2  ;;  %v337_v10 = vpack.c.bf16 %v319_v9, %v319_v9  ;;  %v451_v41 = vrot.slane %v336_v14, %v450_v39  ;;  %v474_v51 = vld [vmem:[%s1326_s4] sm:$0x7]  ;;  %v984_v62 = vld [vmem:[#allocation6 + $0x18] sm:$0xff]   ;;  %v986_v1 = vld [vmem:[#allocation6 + $0x28] sm:$0xff]  }
  0x61   : > { %866 = vmatprep.subr.bf16.mxu0 %v1102_v0  ;;  %v479_v52 = vrot.slane %v474_v51, %v340_v13  ;;  %v981_v59 = vld [vmem:[#allocation6] sm:$0xff]   ;;  %v987_v2 = vld [vmem:[#allocation6 + $0x30] sm:$0xff]   ;;  %v583_v11 = vrot.slane %v474_v51, %v444_v37  ;;  %v589_v13 = vrot.slane %v474_v51, %v450_v39 }
  0x62   : > { %885 = vmatpush3.bf16.msra.mxu1 %v974_v23  ;;  %v985_v63 = vld [vmem:[#allocation6 + $0x20] sm:$0xff]  }
  0x63   : > { %886 = vmatprep.subr.bf16.mxu1 %v1102_v0  ;;  %v824_v22 = vld [vmem:[%s1328_s6] ss:$0 sm:$0xff] }
  0x64   : > { %867 = vmatpush3.bf16.msra.mxu0 %v967_v3  ;;  %v988_v3 = vld [vmem:[#allocation6 + $0x38] sm:$0xff]  }
  0x65   : > { %868 = vmatprep.subr.bf16.mxu0 %v1102_v0 }
  0x66   : > { %887 = vmatpush3.bf16.msra.mxu1 %v975_v24 }
  0x67   : > { %888 = vmatprep.subr.bf16.mxu1 %v1102_v0 }
  0x68   : > { %869 = vmatpush3.bf16.msra.mxu0 %v968_v4 }
  0x69   : > { %870 = vmatprep.subr.bf16.mxu0 %v1102_v0 }
  0x6a   : > { %889 = vmatpush3.bf16.msra.mxu1 %v976_v25 }
  0x6b   : > { %890 = vmatprep.subr.bf16.mxu1 %v1102_v0 }
  0x6c   : > { %871 = vmatpush3.bf16.msra.mxu0 %v969_v5 }
  0x6d   : > { %872 = vmatprep.subr.bf16.mxu0 %v1102_v0 }
  0x6e   : > { %891 = vmatpush3.bf16.msra.mxu1 %v977_v26 }
  0x6f   : > { %892 = vmatprep.subr.bf16.mxu1 %v1102_v0 }
  0x70   : > { %873 = vmatpush3.bf16.msra.mxu0 %v970_v6 }
  0x71   : > { %874 = vmatprep.subr.bf16.mxu0 %v1102_v0 }
  0x72   : > { %893 = vmatpush3.bf16.msra.mxu1 %v978_v27 }
  0x73   : > { %894 = vmatprep.subr.bf16.mxu1 %v1102_v0 }
  0x74   : > { %875 = vmatpush3.bf16.msra.mxu0 %v971_v7 }
  0x75   : > { %876 = vmatprep.subr.bf16.mxu0 %v1102_v0 }
  0x76   : > { %895 = vmatpush3.bf16.msra.mxu1 %v979_v28 }
  0x77   : > { %896 = vmatprep.subr.bf16.mxu1 %v1102_v0 }
  0x78   : > { %877 = vmatpush3.bf16.msra.mxu0 %v972_v8 }
  0x79   : > { %902 = vmatprep.subr.bf16.mxu0 %v1102_v0 }
  0x7a   : > { %897 = vmatpush3.bf16.msra.mxu1 %v980_v29 }
  0x7b   : > { %879 = vmatmul.mubr.bf16.vlgmr.msra.gmra.mrb[0].mxu0 %v337_v10 }
  0x7c   : > { %918 = vmatprep.mubr.msk.bf16.mxu0 %vm1103_vm0, %v1102_v0  ;;  %903 = vmatpush3.bf16.msra.mxu0 %v981_v59 }
  0x7d   : > { %904 = vmatprep.subr.bf16.mxu0 %v1102_v0 }
  0x80   : > { %905 = vmatpush3.bf16.msra.mxu0 %v982_v60 }
  0x81   : > { %906 = vmatprep.subr.bf16.mxu0 %v1102_v0 }
  0x84   : > { %907 = vmatpush3.bf16.msra.mxu0 %v983_v61 }
  0x85   : > { %908 = vmatprep.subr.bf16.mxu0 %v1102_v0 }
  0x88   : > { %909 = vmatpush3.bf16.msra.mxu0 %v984_v62 }
  0x89   : > { %910 = vmatprep.subr.bf16.mxu0 %v1102_v0 }
  0x8c   : > { %911 = vmatpush3.bf16.msra.mxu0 %v985_v63 }
  0x8d   : > { %912 = vmatprep.subr.bf16.mxu0 %v1102_v0 }
  0x90   : > { %913 = vmatpush3.bf16.msra.mxu0 %v986_v1 }
  0x91   : > { %914 = vmatprep.subr.bf16.mxu0 %v1102_v0 }
  0x94   : > { %915 = vmatpush3.bf16.msra.mxu0 %v987_v2 }
  0x95   : > { %916 = vmatprep.subr.bf16.mxu0 %v1102_v0 }
  0x98   : > { %917 = vmatpush3.bf16.msra.mxu0 %v988_v3 }
 0x14e   : > { %v424_v16 = vpop.f32.mrb[0].mxu0 }
 0x14f   : > { %v425_v17 = vadd.f32 %v424_v16, %v341_v15  ;;  %v880_v18 = vpop.f32.mrb[1].mxu0 }
 0x150   : > { %v427_v19 = vpop.f32.mrb[2].mxu0 }
 0x151   : > { %430 = vadd.xlane.f32.xlu0 %v425_v17  ;;  %v881_v20 = vpop.f32.mrb[3].mxu0  ;;  %v432_v21 = vmul.f32 %v425_v17, %v425_v17 }
 0x155   : > { %433 = vadd.xlane.f32.xlu0 %v432_v21 }
 0x1de   : > { %v431_v30 = vpop.xlane.xlu0 %430 }
 0x1df   : > { %v435_v31 = vmul.f32 0.0078125, %v431_v30 }
 0x1e1   : > { %v437_v33 = vmul.f32 %v435_v31, %v435_v31  ;;  %v441_v42 = vsub.f32 %v425_v17, %v435_v31 }
 0x1e2   : > { %v434_v32 = vpop.xlane.xlu0 %433 }
 0x1e3   : > { %v436_v34 = vmul.f32 0.0078125, %v434_v32 }
 0x1e5   : > { %v438_v35 = vsub.f32 %v436_v34, %v437_v33 }
 0x1e7   : > { %v439_v36 = vadd.f32 0.001, %v438_v35 }
 0x1e9   : > { %989 = vrsqrt.f32 %v439_v36 }
 0x1f3   : > { %v990_v40 = vpop.eup %989 }
 0x1f4   : > { %v446_v43 = vmul.f32 %v990_v40, %v445_v38 }
 0x1f6   : > { %v447_v44 = vmul.f32 %v446_v43, %v441_v42 }
 0x1f8   : > { %v452_v45 = vadd.f32 %v451_v41, %v447_v44 }
 0x1fa   : > { %v454_v46 = vmul.f32 1.442695, %v452_v45  ;;  %vm453_vm1 = vcmp.gt.f32.partialorder %v452_v45, 0.0 }
 0x1fc   : > { %991 = vpow2.f32 %v454_v46 }
 0x206   : > { %v992_v47 = vpop.eup %991 }
 0x207   : > { %v814_v48 = vadd.f32 -1.0, %v992_v47 }
 0x209   : > { %v457_v49 = vsel %vm453_vm1, %v452_v45, %v814_v48 }
 0x20a   : > { %v475_v50 = vpack.c.bf16 %v457_v49, %v457_v49 }
 0x20c   : > { %899 = vmatmul.mubr.bf16.vlgmr.msra.gmra.mrb[0].mxu1 %v475_v50 }
 0x2df   : > { %v562_v53 = vpop.f32.mrb[0].mxu1 }
 0x2e0   : > { %v563_v54 = vadd.f32 %v562_v53, %v479_v52  ;;  %v900_v55 = vpop.f32.mrb[1].mxu1 }
 0x2e1   : > { %v565_v56 = vpop.f32.mrb[2].mxu1 }
 0x2e2   : > { %568 = vadd.xlane.f32.xlu1 %v563_v54  ;;  %v901_v57 = vpop.f32.mrb[3].mxu1  ;;  %v570_v58 = vmul.f32 %v563_v54, %v563_v54 }
 0x2e6   : > { %571 = vadd.xlane.f32.xlu1 %v570_v58 }
 0x36f   : > { %v569_v4 = vpop.xlane.xlu1 %568 }
 0x370   : > { %v573_v5 = vmul.f32 0.0078125, %v569_v4 }
 0x372   : > { %v575_v7 = vmul.f32 %v573_v5, %v573_v5  ;;  %v579_v14 = vsub.f32 %v563_v54, %v573_v5 }
 0x373   : > { %v572_v6 = vpop.xlane.xlu1 %571 }
 0x374   : > { %v574_v8 = vmul.f32 0.0078125, %v572_v6 }
 0x376   : > { %v576_v9 = vsub.f32 %v574_v8, %v575_v7 }
 0x378   : > { %v577_v10 = vadd.f32 0.001, %v576_v9 }
 0x37a   : > { %993 = vrsqrt.f32 %v577_v10 }
 0x384   : > { %v994_v12 = vpop.eup %993 }
 0x385   : > { %v584_v15 = vmul.f32 %v994_v12, %v583_v11 }
 0x387   : > { %v585_v16 = vmul.f32 %v584_v15, %v579_v14 }
 0x389   : > { %v590_v17 = vadd.f32 %v589_v13, %v585_v16 }
 0x38b   : > { %v592_v18 = vmul.f32 1.442695, %v590_v17  ;;  %vm591_vm2 = vcmp.gt.f32.partialorder %v590_v17, 0.0 }
 0x38d   : > { %995 = vpow2.f32 %v592_v18 }
 0x397   : > { %v996_v0 = vpop.eup %995 }
 0x398   : > { %v823_v19 = vadd.f32 -1.0, %v996_v0 }
 0x39a   : > { %v595_v20 = vsel %vm591_vm2, %v590_v17, %v823_v19 }
 0x39b   : > { %v613_v21 = vpack.c.bf16 %v595_v20, %v595_v20 }
 0x39d   : > { %919 = vmatmul.mubr.bf16.vlgmr.msra.gmra.mrb[4].mxu0 %v613_v21 }
 0x470   : > { %v702_v23 = vpop.f32.mrb[4].mxu0 }
 0x471   : > { %v703_v24 = vadd.f32 %v824_v22, %v702_v23  ;;  %v920_v25 = vpop.f32.mrb[5].mxu0 }
 0x472   : > { %v705_v26 = vpop.f32.mrb[6].mxu0 }
 0x473   : > { %708 = vst [vmem:[%s317_s19] sm:$0xff] %v703_v24  ;;  %v921_v27 = vpop.f32.mrb[7].mxu0 }
 0x474 PF: > { %s19_s24 = sadd.s32 1, %s1095_s24  }
 0x475   : > { %p16_p9 = scmp.ge.s32.totalorder %s19_s24, 4  }
 0x477   :  { %18 = sbr.rel (!%p16_p9) target bundleno = 2 (0x2), region = 91 }
 0x47e   :  { %728 = vsyncpa [#allocation3], 1 }
 0x47f   :  { %730 = vsyncpa [#allocation3 + $0x1], 1 }
 0x480   :  { %731 = vsyncpa [#allocation5], 1 }

</bundles_post_ra>
